<compile_context>
chip_gen: v7x
topology: tpu7x:2x2x1
jax: 0.10.0
libtpu: 0.0.40
codegen_flags: <defaults>
</compile_context>

<pallas_src>
import functools

import jax
import jax.numpy as jnp
from jax.experimental import pallas as pl
from jax.experimental.pallas import tpu as pltpu

LANES = 128
MAX_BLOCK_ROWS = 8192     # (8192, 128) f32 tile = 4 MiB per input per buffer
SUB_ROWS_MAX = 512        # in-kernel accumulation chunk (<=256 KiB f32 temps)


def _pick_sub_rows(block_rows):
    """Largest multiple of 8 that divides block_rows and is <= SUB_ROWS_MAX."""
    if block_rows <= SUB_ROWS_MAX:
        return block_rows
    for cand in range(SUB_ROWS_MAX, 7, -8):
        if block_rows % cand == 0:
            return cand
    return block_rows  # unreachable: block_rows % 8 == 0 guarantees cand == 8


def _jaccard_kernel(rows_in_last_block, sub_rows,
                    smooth_ref, x_ref, t_ref, out_ref, acc_prod, acc_sum):
    i = pl.program_id(0)
    nblocks = pl.num_programs(0)
    block_rows = x_ref.shape[0]
    n_sub = block_rows // sub_rows

    @pl.when(i == 0)
    def _init():
        acc_prod[...] = jnp.zeros_like(acc_prod)
        acc_sum[...] = jnp.zeros_like(acc_sum)

    def chunk_update(off, masked):
        s = jax.nn.sigmoid(x_ref[pl.ds(off, sub_rows), :].astype(jnp.float32))
        t = t_ref[pl.ds(off, sub_rows), :].astype(jnp.float32)
        if masked:
            row = jax.lax.broadcasted_iota(jnp.int32, (sub_rows, LANES), 0) + off
            valid = row < rows_in_last_block
            s = jnp.where(valid, s, 0.0)
            t = jnp.where(valid, t, 0.0)
        # Fold (sub_rows, 128) into the vreg-scale (8, 128) accumulators with
        # VPU adds; the reshape keeps whole (8,128) tiles so there is no copy.
        acc_prod[...] += (s * t).reshape(sub_rows // 8, 8, LANES).sum(axis=0)
        acc_sum[...] += (s + t).reshape(sub_rows // 8, 8, LANES).sum(axis=0)

    def accumulate_block(masked):
        if n_sub == 1:
            chunk_update(0, masked)
        else:
            def body(c, carry):
                chunk_update(pl.multiple_of(c * sub_rows, sub_rows), masked)
                return carry
            jax.lax.fori_loop(0, n_sub, body, 0)

    if rows_in_last_block is None:
        # Every block is fully valid -> unmasked accumulation everywhere.
        accumulate_block(masked=False)
    else:
        @pl.when(i != nblocks - 1)
        def _full_block():
            accumulate_block(masked=False)

        @pl.when(i == nblocks - 1)
        def _partial_block():
            accumulate_block(masked=True)

    @pl.when(i == nblocks - 1)
    def _finalize():
        intersection = jnp.sum(acc_prod[...])
        total = jnp.sum(acc_sum[...])
        union = total - intersection
        smooth = smooth_ref[0]
        out_ref[0, 0] = (intersection + smooth) / (union + smooth)


def jaccard_index(inputs, targets, smooth=1.0, max_block_rows=MAX_BLOCK_ROWS):
    """Pallas implementation of JaccardIndex.forward."""
    x = jnp.asarray(inputs).reshape(-1)   # native dtype, no upcast in wrapper
    t = jnp.asarray(targets).reshape(-1)
    n = x.shape[0]

    # Pad only the (< 8*128 element) flat tail so the row count is a multiple
    # of 8 sublanes.  Inputs pad with -1e4 (sigmoid -> exactly 0), targets
    # with 0, so padding contributes exactly 0 to both running sums.
    rows = pl.cdiv(n, LANES)
    rows8 = ((rows + 7) // 8) * 8
    padded_n = rows8 * LANES
    if padded_n != n:
        pad = padded_n - n
        x = jnp.pad(x, (0, pad), constant_values=-1e4)
        t = jnp.pad(t, (0, pad), constant_values=0)
    x2 = x.reshape(rows8, LANES)
    t2 = t.reshape(rows8, LANES)

    max_block_rows = max(8, (int(max_block_rows) // 8) * 8)
    if rows8 <= max_block_rows:
        block_rows = rows8            # full-extent block
        num_blocks = 1
        rows_in_last = None
    else:
        block_rows = max_block_rows
        num_blocks = pl.cdiv(rows8, block_rows)
        rem = rows8 - (num_blocks - 1) * block_rows
        rows_in_last = None if rem == block_rows else rem

    sub_rows = _pick_sub_rows(block_rows)
    smooth_arr = jnp.asarray([smooth], dtype=jnp.float32)

    # Double-buffered input tiles + slack for on-chip temporaries; stays well
    # under v7x's 64 MiB physical VMEM (and raises v5e's 16 MiB default).
    tile_bytes = block_rows * LANES * (x2.dtype.itemsize + t2.dtype.itemsize)
    vmem_limit = int(min(max(2 * tile_bytes + (8 << 20), 16 << 20), 48 << 20))

    grid_spec = pltpu.PrefetchScalarGridSpec(
        num_scalar_prefetch=0,
        grid=(num_blocks,),
        in_specs=[
            pl.BlockSpec(memory_space=pltpu.SMEM),                 # smooth
            pl.BlockSpec((block_rows, LANES), lambda i: (i, 0)),   # inputs
            pl.BlockSpec((block_rows, LANES), lambda i: (i, 0)),   # targets
        ],
        out_specs=pl.BlockSpec(memory_space=pltpu.SMEM),
        scratch_shapes=[
            pltpu.VMEM((8, LANES), jnp.float32),   # acc_prod (vreg-scale)
            pltpu.VMEM((8, LANES), jnp.float32),   # acc_sum  (vreg-scale)
        ],
    )

    out = pl.pallas_call(
        functools.partial(_jaccard_kernel, rows_in_last, sub_rows),
        out_shape=jax.ShapeDtypeStruct((1, 1), jnp.float32),
        grid_spec=grid_spec,
        compiler_params=pltpu.CompilerParams(
            dimension_semantics=("arbitrary",),
            vmem_limit_bytes=vmem_limit),
    )(smooth_arr, x2, t2)
    return out[0, 0]


def _jaccard_ref(inputs, targets, smooth=1.0):
    s = jax.nn.sigmoid(inputs.reshape(-1).astype(jnp.float32))
    t = targets.reshape(-1).astype(jnp.float32)
    intersection = jnp.sum(s * t)
    total = jnp.sum(s + t)
    union = total - intersection
    return (intersection + smooth) / (union + smooth)


if __name__ == "__main__":
    key = jax.random.PRNGKey(0)
    k1, k2, k3, k4 = jax.random.split(key, 4)

    # Primary case: NCHW logits + binary mask (typical segmentation use).
    inputs = jax.random.normal(k1, (2, 4, 16, 16), dtype=jnp.float32)
    targets = (jax.random.uniform(k2, (2, 4, 16, 16)) > 0.5).astype(jnp.float32)
    iou = jax.block_until_ready(jaccard_index(inputs, targets, smooth=1.0))
    ref = _jaccard_ref(inputs, targets, smooth=1.0)
    assert jnp.allclose(iou, ref, rtol=1e-5, atol=1e-5), (iou, ref)

    # Odd size (not a multiple of 8*128) -> exercises the tail-padding path.
    inputs2 = jax.random.normal(k3, (3, 5, 17, 13), dtype=jnp.float32)
    targets2 = (jax.random.uniform(k4, (3, 5, 17, 13)) > 0.5).astype(jnp.float32)
    iou2 = jax.block_until_ready(jaccard_index(inputs2, targets2, smooth=1.0))
    ref2 = _jaccard_ref(inputs2, targets2, smooth=1.0)
    assert jnp.allclose(iou2, ref2, rtol=1e-5, atol=1e-5), (iou2, ref2)

    # Small max_block_rows forces the multi-block grid, the masked partial
    # last block and the in-kernel sub-chunk loop, so every code path runs.
    inputs3 = jax.random.normal(k1, (2, 4, 128, 160), dtype=jnp.float32)
    targets3 = (jax.random.uniform(k2, (2, 4, 128, 160)) > 0.5).astype(jnp.float32)
    iou3 = jax.block_until_ready(
        jaccard_index(inputs3, targets3, smooth=1.0, max_block_rows=1024))
    ref3 = _jaccard_ref(inputs3, targets3, smooth=1.0)
    assert jnp.allclose(iou3, ref3, rtol=1e-4, atol=1e-5), (iou3, ref3)

    print("KERNEL_OK")
</pallas_src>

<mosaic_0001>
module attributes {stable_mosaic.version = 11 : i64} {
  func.func @_jaccard_kernel(%arg0: i32, %arg1: memref<1xf32, #tpu.memory_space<smem>>, %arg2: memref<16x128xf32, #tpu.memory_space<vmem>>, %arg3: memref<16x128xf32, #tpu.memory_space<vmem>>, %arg4: memref<1x1xf32, #tpu.memory_space<smem>>, %arg5: memref<8x128xf32, #tpu.memory_space<vmem>>, %arg6: memref<8x128xf32, #tpu.memory_space<vmem>>) attributes {dimension_semantics = [#tpu.dimension_semantics<arbitrary>], iteration_bounds = array<i64: 1>, scalar_prefetch = 0 : i64, scratch_operands = 2 : i64, tpu.core_type = #tpu.core_type<tc>, window_params = [{transform_indices = @transform_0, window_bounds = array<i64: 1>}, {transform_indices = @transform_1, window_bounds = array<i64: 16, 128>}, {transform_indices = @transform_2, window_bounds = array<i64: 16, 128>}, {transform_indices = @transform_3, window_bounds = array<i64: 1, 1>}]} {
    %c0_i32 = arith.constant 0 : i32
    %0 = arith.cmpi eq, %arg0, %c0_i32 : i32
    %1 = arith.extui %0 : i1 to i32
    %c0_i32_0 = arith.constant 0 : i32
    %2 = arith.cmpi ne, %1, %c0_i32_0 : i32
    scf.if %2 {
      %cst_16 = arith.constant 0.000000e+00 : f32
      %25 = vector.broadcast %cst_16 : f32 to vector<8x128xf32>
      %c0_17 = arith.constant 0 : index
      %c0_18 = arith.constant 0 : index
      %26 = vector.load %arg5[%c0_17, %c0_18] : memref<8x128xf32, #tpu.memory_space<vmem>>, vector<8x128xf32>
      tpu.vector_store %arg5[%c0_17, %c0_18], %25 {strides = array<i32>} : memref<8x128xf32, #tpu.memory_space<vmem>>, vector<8x128xf32>,
      %cst_19 = arith.constant 0.000000e+00 : f32
      %27 = vector.broadcast %cst_19 : f32 to vector<8x128xf32>
      %c0_20 = arith.constant 0 : index
      %c0_21 = arith.constant 0 : index
      %28 = vector.load %arg6[%c0_20, %c0_21] : memref<8x128xf32, #tpu.memory_space<vmem>>, vector<8x128xf32>
      tpu.vector_store %arg6[%c0_20, %c0_21], %27 {strides = array<i32>} : memref<8x128xf32, #tpu.memory_space<vmem>>, vector<8x128xf32>,
    } else {
    }
    %c0 = arith.constant 0 : index
    %c0_1 = arith.constant 0 : index
    %3 = vector.load %arg2[%c0, %c0_1] : memref<16x128xf32, #tpu.memory_space<vmem>>, vector<16x128xf32>
    %4 = arith.negf %3 : vector<16x128xf32>
    %5 = math.exp %4 : vector<16x128xf32>
    %cst = arith.constant 1.000000e+00 : f32
    %6 = vector.broadcast %cst : f32 to vector<16x128xf32>
    %7 = arith.addf %6, %5 : vector<16x128xf32>
    %8 = arith.divf %6, %7 : vector<16x128xf32>
    %c0_2 = arith.constant 0 : index
    %c0_3 = arith.constant 0 : index
    %9 = vector.load %arg3[%c0_2, %c0_3] : memref<16x128xf32, #tpu.memory_space<vmem>>, vector<16x128xf32>
    %c0_4 = arith.constant 0 : index
    %c0_5 = arith.constant 0 : index
    %10 = vector.load %arg5[%c0_4, %c0_5] : memref<8x128xf32, #tpu.memory_space<vmem>>, vector<8x128xf32>
    %11 = arith.mulf %8, %9 : vector<16x128xf32>
    %12 = vector.shape_cast %11 : vector<16x128xf32> to vector<2x8x128xf32>
    %cst_6 = arith.constant dense<0.000000e+00> : vector<8x128xf32>
    %13 = vector.multi_reduction <add>, %12, %cst_6 [0] : vector<2x8x128xf32> to vector<8x128xf32>
    %14 = arith.addf %10, %13 : vector<8x128xf32>
    %c0_7 = arith.constant 0 : index
    %c0_8 = arith.constant 0 : index
    %15 = vector.load %arg5[%c0_7, %c0_8] : memref<8x128xf32, #tpu.memory_space<vmem>>, vector<8x128xf32>
    tpu.vector_store %arg5[%c0_7, %c0_8], %14 {strides = array<i32>} : memref<8x128xf32, #tpu.memory_space<vmem>>, vector<8x128xf32>,
    %c0_9 = arith.constant 0 : index
    %c0_10 = arith.constant 0 : index
    %16 = vector.load %arg6[%c0_9, %c0_10] : memref<8x128xf32, #tpu.memory_space<vmem>>, vector<8x128xf32>
    %17 = arith.addf %8, %9 : vector<16x128xf32>
    %18 = vector.shape_cast %17 : vector<16x128xf32> to vector<2x8x128xf32>
    %cst_11 = arith.constant dense<0.000000e+00> : vector<8x128xf32>
    %19 = vector.multi_reduction <add>, %18, %cst_11 [0] : vector<2x8x128xf32> to vector<8x128xf32>
    %20 = arith.addf %16, %19 : vector<8x128xf32>
    %c0_12 = arith.constant 0 : index
    %c0_13 = arith.constant 0 : index
    %21 = vector.load %arg6[%c0_12, %c0_13] : memref<8x128xf32, #tpu.memory_space<vmem>>, vector<8x128xf32>
    tpu.vector_store %arg6[%c0_12, %c0_13], %20 {strides = array<i32>} : memref<8x128xf32, #tpu.memory_space<vmem>>, vector<8x128xf32>,
    %c0_i32_14 = arith.constant 0 : i32
    %22 = arith.cmpi eq, %arg0, %c0_i32_14 : i32
    %23 = arith.extui %22 : i1 to i32
    %c0_i32_15 = arith.constant 0 : i32
    %24 = arith.cmpi ne, %23, %c0_i32_15 : i32
    scf.if %24 {
      %c0_16 = arith.constant 0 : index
      %c0_17 = arith.constant 0 : index
      %25 = vector.load %arg5[%c0_16, %c0_17] : memref<8x128xf32, #tpu.memory_space<vmem>>, vector<8x128xf32>
      %26 = vector.shape_cast %25 : vector<8x128xf32> to vector<1x8x128xf32>
      %cst_18 = arith.constant dense<0.000000e+00> : vector<1xf32>
      %27 = vector.multi_reduction <add>, %26, %cst_18 [1, 2] : vector<1x8x128xf32> to vector<1xf32>
      %28 = vector.shape_cast %27 : vector<1xf32> to vector<1x1x1xf32>
      %29 = vector.extract %28[0, 0, 0] : f32 from vector<1x1x1xf32>
      %c0_19 = arith.constant 0 : index
      %c0_20 = arith.constant 0 : index
      %30 = vector.load %arg6[%c0_19, %c0_20] : memref<8x128xf32, #tpu.memory_space<vmem>>, vector<8x128xf32>
      %31 = vector.shape_cast %30 : vector<8x128xf32> to vector<1x8x128xf32>
      %cst_21 = arith.constant dense<0.000000e+00> : vector<1xf32>
      %32 = vector.multi_reduction <add>, %31, %cst_21 [1, 2] : vector<1x8x128xf32> to vector<1xf32>
      %33 = vector.shape_cast %32 : vector<1xf32> to vector<1x1x1xf32>
      %34 = vector.extract %33[0, 0, 0] : f32 from vector<1x1x1xf32>
      %35 = arith.subf %34, %29 : f32
      %c0_22 = arith.constant 0 : index
      %36 = memref.load %arg1[%c0_22] : memref<1xf32, #tpu.memory_space<smem>>
      %37 = arith.addf %29, %36 : f32
      %38 = arith.addf %35, %36 : f32
      %39 = arith.divf %37, %38 : f32
      %c0_23 = arith.constant 0 : index
      %c0_24 = arith.constant 0 : index
      %40 = memref.load %arg4[%c0_23, %c0_24] : memref<1x1xf32, #tpu.memory_space<smem>>
      memref.store %39, %arg4[%c0_23, %c0_24] : memref<1x1xf32, #tpu.memory_space<smem>>
    } else {
    }
    return
  }
  func.func @transform_0(%arg0: i32) -> i32 {
    %c0_i32 = arith.constant 0 : i32
    %c0_i32_0 = arith.constant 0 : i32
    return %c0_i32 : i32
  }
  func.func @transform_1(%arg0: i32) -> (i32, i32) {
    %c0_i32 = arith.constant 0 : i32
    %c0_i32_0 = arith.constant 0 : i32
    return %arg0, %c0_i32 : i32, i32
  }
  func.func @transform_2(%arg0: i32) -> (i32, i32) {
    %c0_i32 = arith.constant 0 : i32
    %c0_i32_0 = arith.constant 0 : i32
    return %arg0, %c0_i32 : i32, i32
  }
  func.func @transform_3(%arg0: i32) -> (i32, i32) {
    %c0_i32 = arith.constant 0 : i32
    %c0_i32_0 = arith.constant 0 : i32
    %c0_i32_1 = arith.constant 0 : i32
    return %c0_i32, %c0_i32_0 : i32, i32
  }
}

</mosaic_0001>

<bundles_post_ra>
// kernel: tpu_custom_call.1
= control target key start
LH: loop header
LB: loop body
LE: loop exit
PB: predicated region body
PF: predicated region fallthrough
CT: control target
= control target key end

     0   :  { %9 = vsyncpa [#allocation6], 0  ;;  %s276_s0 = inlined_call_operand.<no memory space> [shape: f32[1], index: 0, kind: input, shape index: {}]   ;;  %s277_s1 = inlined_call_operand.hbm [shape: f32[16,128], index: 1, kind: input, shape index: {}]   ;;  %s278_s2 = inlined_call_operand.hbm [shape: f32[16,128], index: 2, kind: input, shape index: {}]   ;;  %s279_s3 = inlined_call_operand.hbm [shape: f32[1,1], index: 3, kind: output, shape index: {}]  }
   0x1   :  { %10 = vsyncpa [#allocation9], 0 }
   0x2   :  { %11 = vsyncpa [#allocation7], 0  ;;  %s209_s12 = smov [#allocation5]   ;;  %s149_s16 = scalar_lea.hbm %s277_s1, 256 }
   0x3   :  { %s19_s13 = sshll.u32 %s209_s12, 4  ;;  %p150_p0 = scmp.ne.s32.totalorder %s277_s1, %s149_s16  ;;  %s20_s13 = int_to_ptr.vmem [resolvable:$true] %s19_s13 }
   0x4   :  { %p153_p1 = scmp.lt.u32.totalorder %s149_s16, %s277_s1 }
   0x6   :  { %p155_p2 = pnand %p153_p1, %p150_p0 }
   0x8   :  { %158 = shalt.err (!%p155_p2)
}
   0x9   :  { %s159_s21 = scalar_lea.vmem %s20_s13, 256  ;;  %p164_p4 = scmp.lt.s32.totalorder %s20_s13, %s20_s13 }
   0xa   :  { %p160_p3 = scmp.ne.s32.totalorder %s20_s13, %s159_s21  ;;  %p165_p5 = scmp.lt.s32.totalorder %s159_s21, %s159_s21 }
   0xc   :  { %p166_p6 = por %p165_p5, %p164_p4 }
   0xe   :  { %p167_p7 = pnand %p166_p6, %p160_p3 }
  0x10   :  { %170 = shalt.err (!%p167_p7)
}
  0x11   :  { %s210_s22 = smov 128   ;;  %s211_s23 = smov 8  }
  0x12   :  { %25 = dma.hbm_to_vmem [thread:$0]  %s277_s1, 256, %s20_s13, [#allocation6], %s210_s22, %s210_s22, %s211_s23  }
  0x13   :  { %s212_s26 = smov [#allocation8]   ;;  %s171_s30 = scalar_lea.hbm %s278_s2, 256 }
  0x14   :  { %s31_s27 = sshll.u32 %s212_s26, 4  ;;  %p172_p8 = scmp.ne.s32.totalorder %s278_s2, %s171_s30  ;;  %s32_s27 = int_to_ptr.vmem [resolvable:$true] %s31_s27 }
  0x15   :  { %p175_p9 = scmp.lt.u32.totalorder %s171_s30, %s278_s2 }
  0x17   :  { %p177_p10 = pnand %p175_p9, %p172_p8 }
  0x19   :  { %180 = shalt.err (!%p177_p10)
}
  0x1a   :  { %s181_s8 = scalar_lea.vmem %s32_s27, 256  ;;  %p186_p12 = scmp.lt.s32.totalorder %s32_s27, %s32_s27 }
  0x1b   :  { %p182_p11 = scmp.ne.s32.totalorder %s32_s27, %s181_s8  ;;  %p187_p13 = scmp.lt.s32.totalorder %s181_s8, %s181_s8 }
  0x1d   :  { %p188_p0 = por %p187_p13, %p186_p12 }
  0x1f   :  { %p189_p1 = pnand %p188_p0, %p182_p11 }
  0x21   :  { %192 = shalt.err (!%p189_p1)
}
  0x22   :  { %37 = dma.hbm_to_vmem [thread:$0]  %s278_s2, 256, %s32_s27, [#allocation9], %s210_s22, %s210_s22, %s211_s23  }
  0x23   :  { %203 = dma.done.wait [#allocation6], 256  }
  0x24   :  { %204 = vsyncadd [#allocation6], 4294967040 }
  0x25   :  { %205 = dma.done.wait [#allocation9], 256  }
  0x26   :  { %206 = vsyncadd [#allocation9], 4294967040  ;;  %v50_v0 = vld [vmem:[#allocation5] sm:$0xff]  ;;  %v51_v1 = vld [vmem:[#allocation5 + $0x8] sm:$0xff]  ;;  %s193_s22 = scalar_lea.hbm %s279_s3, 16 }
  0x27   :  { %v126_v2 = vmul.f32 -1.442695, %v50_v0  ;;  %v127_v3 = vmul.f32 -1.442695, %v51_v1  ;;  %v64_v8 = vld [vmem:[#allocation8] sm:$0xff]  ;;  %v65_v9 = vld [vmem:[#allocation8 + $0x8] sm:$0xff]  ;;  %p194_p2 = scmp.ne.s32.totalorder %s279_s3, %s193_s22  ;;  %p197_p3 = scmp.lt.u32.totalorder %s193_s22, %s279_s3 }
  0x29   :  { %139 = vpow2.f32 %v126_v2  ;;  %p199_p4 = pnand %p197_p3, %p194_p2 }
  0x2a   :  { %141 = vpow2.f32 %v127_v3 }
  0x33   :  { %v140_v4 = vpop.eup %139 }
  0x34   :  { %v142_v5 = vpop.eup %141  ;;  %v58_v6 = vadd.f32 1.0, %v140_v4 }
  0x35   :  { %v59_v7 = vadd.f32 1.0, %v142_v5 }
  0x36   :  { %143 = vrcp.f32 %v58_v6 }
  0x37   :  { %145 = vrcp.f32 %v59_v7 }
  0x40   :  { %v144_v10 = vpop.eup %143 }
  0x41   :  { %v146_v11 = vpop.eup %145  ;;  %v67_v12 = vmul.f32 %v144_v10, %v64_v8  ;;  %v73_v14 = vadd.f32 %v144_v10, %v64_v8 }
  0x42   :  { %v68_v13 = vmul.f32 %v146_v11, %v65_v9  ;;  %v74_v15 = vadd.f32 %v146_v11, %v65_v9 }
  0x44   :  { %v69_v16 = vadd.f32 %v68_v13, %v67_v12  ;;  %v75_v17 = vadd.f32 %v74_v15, %v73_v14 }
  0x46   :  { %82 = vadd.xlane.f32.xlu0 %v69_v16 }
  0x4a   :  { %92 = vadd.xlane.f32.xlu0 %v75_v17 }
  0xd3   :  { %v83_v18 = vpop.xlane.xlu0 %82 }
  0xd4   :  { %v84_v19 = vrot.slane %v83_v18, 4 }
  0xd6   :  { %v85_v20 = vadd.f32 %v84_v19, %v83_v18 }
  0xd7   :  { %v93_v21 = vpop.xlane.xlu0 %92 }
  0xd8   :  { %v86_v22 = vrot.slane %v85_v20, 2  ;;  %v94_v23 = vrot.slane %v93_v21, 4 }
  0xda   :  { %v95_v24 = vadd.f32 %v94_v23, %v93_v21  ;;  %v87_v25 = vadd.f32 %v86_v22, %v85_v20 }
  0xdc   :  { %v96_v26 = vrot.slane %v95_v24, 2  ;;  %v88_v27 = vrot.slane %v87_v25, 1 }
  0xde   :  { %v97_v28 = vadd.f32 %v96_v26, %v95_v24  ;;  %v89_v29 = vadd.f32 %v88_v27, %v87_v25 }
  0xe0   :  { %128 = vpush %v89_v29  ;;  %v98_v30 = vrot.slane %v97_v28, 1 }
  0xe2   :  { %v99_v31 = vadd.f32 %v98_v30, %v97_v28 }
  0xe4   :  { %130 = vpush %v99_v31 }
 0x111   :  { %s129_s2 = spop %128 }
 0x112   :  { %s103_s17 = sadd.f32 %s129_s2, %s276_s0 }
 0x115   :  { %s131_s10 = spop %130 }
 0x116   :  { %s101_s11 = ssub.f32 %s131_s10, %s129_s2 }
 0x118   :  { %s104_s14 = sadd.f32 %s101_s11, %s276_s0 }
 0x11a   :  { %v105_v32 = vstv %s104_s14 }
 0x11b   :  { %147 = vrcp.f32 %v105_v32 }
 0x125   :  { %v148_v33 = vpop.eup %147 }
 0x126   :  { %132 = vpush %v148_v33 }
 0x157   :  { %s133_s18 = spop %132 }
 0x158   :  { %s108_s19 = smul.f32 %s133_s18, %s103_s17 }
 0x15a   :  { %110 = sst [smem:[#allocation10]] %s108_s19 }
 0x15b   :  { %202 = shalt.err (!%p199_p4)
}
 0x15c   :  { %s213_s27 = smov [#allocation10]  }
 0x15d   :  { %118 = dma.smem_to_hbm %s213_s27, 16, %s279_s3, [#allocation7]  }
 0x15e   :  { %207 = dma.done.wait [#allocation7], 16  }
 0x15f   :  { %208 = vsyncadd [#allocation7], 4294967280 }
 0x160   :  { %122 = sfence }
 0x161   :  { %123 = vsyncpa [#allocation6], 1 }
 0x162   :  { %124 = vsyncpa [#allocation9], 1 }
 0x163   :  { %125 = vsyncpa [#allocation7], 1 }

</bundles_post_ra>
